<compile_context>
chip_gen: v6e
topology: v6e:2x2x1
jax: 0.10.0
libtpu: 0.0.40
codegen_flags: <defaults>
</compile_context>

<pallas_src>
import jax
import jax.numpy as jnp
from jax.experimental import pallas as pl
from jax.experimental.pallas import tpu as pltpu

K_SIZE = 3  # kernel size of the ECA Conv1d


def _eca_kernel(w_ref, x_ref, o_ref):
    # w_ref : SMEM (K_SIZE,) float32  -- scalar-prefetched Conv1d weight
    # x_ref : VMEM (Bt, C, HW)        -- Bt batch images, spatial flattened
    # o_ref : VMEM (Bt, C, HW)
    x = x_ref[...]                                   # native dtype, no full upcast
    C = x.shape[1]
    hw = x.shape[2]

    # 1. Global average pool over the flattened spatial axis, f32 accumulation.
    pooled = jnp.sum(x, axis=-1, dtype=jnp.float32) * (1.0 / hw)      # (Bt, C)

    # 2. Conv1d(1, 1, k=3, padding=1, bias=False) along the channel axis:
    #    y[c] = w0*p[c-1] + w1*p[c] + w2*p[c+1]  (zero padded). Operates on a
    #    tiny (Bt, C) array -> negligible next to the rescale pass.
    p_pad = jnp.pad(pooled, ((0, 0), (1, 1)))                         # (Bt, C+2)
    y = (w_ref[0] * p_pad[:, 0:C]
         + w_ref[1] * p_pad[:, 1:C + 1]
         + w_ref[2] * p_pad[:, 2:C + 2])                              # (Bt, C)

    # 3. Sigmoid gate (kept in f32 — it is only C elements; cast once below).
    gate = jax.nn.sigmoid(y)

    # 4. Channel-wise rescale in the input dtype.
    o_ref[...] = (x * gate.astype(x.dtype)[:, :, None]).astype(o_ref.dtype)


def eca_forward(x, conv_weight, *, vmem_budget_bytes=16 * 1024 * 1024):
    """ECA forward. x: (B, C, H, W); conv_weight: (K_SIZE,) float32."""
    B, C, H, W = x.shape
    HW = H * W
    x2 = x.reshape(B, C, HW)                 # lane-dense layout (free bitcast)

    # Batch tile: double-buffered input + output => 4 resident tiles in VMEM.
    bytes_per_img = C * HW * jnp.dtype(x.dtype).itemsize
    max_bt = max(1, int(vmem_budget_bytes) // (4 * bytes_per_img))
    bt = max(d for d in range(1, B + 1) if B % d == 0 and d <= max_bt)
    # NOTE: if a single (C, H*W) slab ever exceeds the VMEM budget (huge
    # feature maps), split the gate computation from the rescale pass so the
    # heavy multiply can be tiled along C / spatial and across both v7x TCs.

    out = pl.pallas_call(
        _eca_kernel,
        out_shape=jax.ShapeDtypeStruct((B, C, HW), x.dtype),
        grid_spec=pltpu.PrefetchScalarGridSpec(
            num_scalar_prefetch=1,            # conv weight -> SMEM, once
            grid=(B // bt,),
            in_specs=[pl.BlockSpec((bt, C, HW), lambda b, w: (b, 0, 0))],
            out_specs=pl.BlockSpec((bt, C, HW), lambda b, w: (b, 0, 0)),
        ),
        compiler_params=pltpu.CompilerParams(
            dimension_semantics=("parallel",)),
    )(conv_weight, x2)
    return out.reshape(B, C, H, W)


def eca_reference(x, conv_weight):
    """Pure-JAX reference mirroring the PyTorch forward."""
    xf = x.astype(jnp.float32)
    C = x.shape[1]
    pooled = jnp.mean(xf, axis=(2, 3))                        # (B, C)
    p_pad = jnp.pad(pooled, ((0, 0), (1, 1)))                 # (B, C+2)
    y = (conv_weight[0] * p_pad[:, 0:C]
         + conv_weight[1] * p_pad[:, 1:C + 1]
         + conv_weight[2] * p_pad[:, 2:C + 2])
    y = jax.nn.sigmoid(y)
    return (xf * y[:, :, None, None]).astype(x.dtype)


if __name__ == "__main__":
    key = jax.random.PRNGKey(0)
    kx, kw = jax.random.split(key)

    B, C, H, W = 2, 4, 16, 16
    x = jax.random.normal(kx, (B, C, H, W), dtype=jnp.float32)

    # Conv1d(1, 1, k=3, bias=False) weight (torch shape (1,1,3), squeezed).
    bound = 1.0 / (1 * K_SIZE) ** 0.5
    conv_weight = jax.random.uniform(
        kw, (K_SIZE,), dtype=jnp.float32, minval=-bound, maxval=bound)

    out = jax.block_until_ready(eca_forward(x, conv_weight))
    ref = eca_reference(x, conv_weight)

    assert out.shape == x.shape and out.dtype == x.dtype
    assert jnp.allclose(out, ref, atol=1e-5, rtol=1e-5)
    print("KERNEL_OK")
</pallas_src>

<mosaic_0001>
module attributes {stable_mosaic.version = 11 : i64} {
  func.func @_eca_kernel(%arg0: i32, %arg1: memref<3xf32, #tpu.memory_space<smem>>, %arg2: memref<2x4x256xf32, #tpu.memory_space<vmem>>, %arg3: memref<2x4x256xf32, #tpu.memory_space<vmem>>) attributes {dimension_semantics = [#tpu.dimension_semantics<parallel>], iteration_bounds = array<i64: 1>, scalar_prefetch = 1 : i64, scratch_operands = 0 : i64, tpu.core_type = #tpu.core_type<tc>, window_params = [{transform_indices = @transform_0, window_bounds = array<i64: 2, 4, 256>}, {transform_indices = @transform_1, window_bounds = array<i64: 2, 4, 256>}]} {
    %c0 = arith.constant 0 : index
    %c0_0 = arith.constant 0 : index
    %c0_1 = arith.constant 0 : index
    %0 = vector.load %arg2[%c0, %c0_0, %c0_1] : memref<2x4x256xf32, #tpu.memory_space<vmem>>, vector<2x4x256xf32>
    %cst = arith.constant dense<0.000000e+00> : vector<2x4xf32>
    %1 = vector.multi_reduction <add>, %0, %cst [2] : vector<2x4x256xf32> to vector<2x4xf32>
    %cst_2 = arith.constant 3.906250e-03 : f32
    %2 = vector.broadcast %cst_2 : f32 to vector<2x4xf32>
    %3 = arith.mulf %1, %2 : vector<2x4xf32>
    %c0_i32 = arith.constant 0 : i32
    %4 = arith.sitofp %c0_i32 : i32 to f32
    %5 = vector.broadcast %4 : f32 to vector<2x1xf32>
    %6 = tpu.concatenate %5, %3 in 1 : vector<2x1xf32>, vector<2x4xf32> -> vector<2x5xf32>
    %7 = vector.broadcast %4 : f32 to vector<2x1xf32>
    %8 = tpu.concatenate %6, %7 in 1 : vector<2x5xf32>, vector<2x1xf32> -> vector<2x6xf32>
    %c0_3 = arith.constant 0 : index
    %9 = memref.load %arg1[%c0_3] : memref<3xf32, #tpu.memory_space<smem>>
    %10 = vector.extract_strided_slice %8 {offsets = [0, 0], sizes = [2, 4], strides = [1, 1]} : vector<2x6xf32> to vector<2x4xf32>
    %11 = vector.broadcast %9 : f32 to vector<2x4xf32>
    %12 = arith.mulf %11, %10 : vector<2x4xf32>
    %c1 = arith.constant 1 : index
    %13 = memref.load %arg1[%c1] : memref<3xf32, #tpu.memory_space<smem>>
    %14 = vector.extract_strided_slice %8 {offsets = [0, 1], sizes = [2, 4], strides = [1, 1]} : vector<2x6xf32> to vector<2x4xf32>
    %15 = vector.broadcast %13 : f32 to vector<2x4xf32>
    %16 = arith.mulf %15, %14 : vector<2x4xf32>
    %17 = arith.addf %12, %16 : vector<2x4xf32>
    %c2 = arith.constant 2 : index
    %18 = memref.load %arg1[%c2] : memref<3xf32, #tpu.memory_space<smem>>
    %19 = vector.extract_strided_slice %8 {offsets = [0, 2], sizes = [2, 4], strides = [1, 1]} : vector<2x6xf32> to vector<2x4xf32>
    %20 = vector.broadcast %18 : f32 to vector<2x4xf32>
    %21 = arith.mulf %20, %19 : vector<2x4xf32>
    %22 = arith.addf %17, %21 : vector<2x4xf32>
    %23 = arith.negf %22 : vector<2x4xf32>
    %24 = math.exp %23 : vector<2x4xf32>
    %cst_4 = arith.constant 1.000000e+00 : f32
    %25 = vector.broadcast %cst_4 : f32 to vector<2x4xf32>
    %26 = arith.addf %25, %24 : vector<2x4xf32>
    %27 = arith.divf %25, %26 : vector<2x4xf32>
    %28 = vector.shape_cast %27 : vector<2x4xf32> to vector<2x4x1xf32>
    %29 = vector.broadcast %28 : vector<2x4x1xf32> to vector<2x4x256xf32>
    %30 = arith.mulf %0, %29 : vector<2x4x256xf32>
    %c0_5 = arith.constant 0 : index
    %c0_6 = arith.constant 0 : index
    %c0_7 = arith.constant 0 : index
    %31 = vector.load %arg3[%c0_5, %c0_6, %c0_7] : memref<2x4x256xf32, #tpu.memory_space<vmem>>, vector<2x4x256xf32>
    tpu.vector_store %arg3[%c0_5, %c0_6, %c0_7], %30 {strides = array<i32>} : memref<2x4x256xf32, #tpu.memory_space<vmem>>, vector<2x4x256xf32>,
    return
  }
  func.func @transform_0(%arg0: i32, %arg1: memref<3xf32, #tpu.memory_space<smem>>) -> (i32, i32, i32) {
    %c0_i32 = arith.constant 0 : i32
    %c0_i32_0 = arith.constant 0 : i32
    %c0_i32_1 = arith.constant 0 : i32
    return %arg0, %c0_i32, %c0_i32_0 : i32, i32, i32
  }
  func.func @transform_1(%arg0: i32, %arg1: memref<3xf32, #tpu.memory_space<smem>>) -> (i32, i32, i32) {
    %c0_i32 = arith.constant 0 : i32
    %c0_i32_0 = arith.constant 0 : i32
    %c0_i32_1 = arith.constant 0 : i32
    return %arg0, %c0_i32, %c0_i32_0 : i32, i32, i32
  }
}

</mosaic_0001>

<bundles_post_ra>
// kernel: tpu_custom_call.1
= control target key start
LH: loop header
LB: loop body
LE: loop exit
PB: predicated region body
PF: predicated region fallthrough
CT: control target
= control target key end

     0   :  { %s218_s9 = smov [#allocation3]   ;;  %s268_s0 = inlined_call_operand.hbm [shape: f32[3], index: 0, kind: input, shape index: {}]   ;;  %s269_s1 = inlined_call_operand.hbm [shape: f32[2,4,256], index: 1, kind: input, shape index: {}]   ;;  %s270_s2 = inlined_call_operand.hbm [shape: f32[2,4,256], index: 2, kind: output, shape index: {}]  }
   0x1   :  { %8 = dma.hbm_to_smem %s268_s0, 16, %s218_s9, [#allocation2] }
   0x2   :  { %212 = dma.done.wait [#allocation2], 16 }
   0x3   :  { %213 = vsyncadd [#allocation2], 4294967280 }
   0x4   :  { %10 = sfence }
   0x5   :  { %11 = vsyncpa [#allocation5], 0 }
   0x6   :  { %12 = vsyncpa [#allocation6], 0  ;;  %s219_s12 = smov [#allocation4]  }
   0x7   :  { %s18_s13 = sshll.u32 %s219_s12, 4  ;;  %s19_s13 = int_to_ptr.vmem [resolvable:$true] %s18_s13 }
   0x8   :  { %s180_s14 = scalar_lea.vmem %s19_s13, 256  ;;  %p185_p1 = scmp.lt.s32.totalorder %s19_s13, %s19_s13 }
   0x9   :  { %p181_p0 = scmp.ne.s32.totalorder %s19_s13, %s180_s14  ;;  %p186_p2 = scmp.lt.s32.totalorder %s180_s14, %s180_s14 }
   0xb   :  { %p187_p3 = por %p186_p2, %p185_p1 }
   0xd   :  { %p188_p4 = pnand %p187_p3, %p181_p0 }
   0xf   :  { %191 = shalt.err (!%p188_p4)
}
  0x10   :  { %s220_s15 = smov 128   ;;  %s221_s16 = smov 8  }
  0x11   :  { %24 = dma.hbm_to_vmem [thread:$0]  %s269_s1, 256, %s19_s13, [#allocation5], %s220_s15, %s220_s15, %s221_s16  }
  0x12   :  { %214 = dma.done.wait [#allocation5], 256  }
  0x13   :  { %215 = vsyncadd [#allocation5], 4294967040  ;;  %vm36_vm0 = vcmask 1043456   ;;  %v250_v0 = vld [vmem:[#allocation4] sm:$0xff]  ;;  %v252_v1 = vld [vmem:[#allocation4 + $0x8] sm:$0xff]  ;;  %v51_v10 = vlaneseq  ;;  %s147_s1 = sld [smem:[#allocation3 + $0x1]] }
  0x14   :  { %v32_v2 = vcombine.high %v250_v0, %v250_v0  ;;  %v37_v3 = vsel %vm36_vm0, %v250_v0, 0.0  ;;  %v33_v4 = vcombine.high %v252_v1, %v252_v1  ;;  %v42_v6 = vsel %vm36_vm0, %v252_v1, 0.0  ;;  %s148_s18 = sld [smem:[#allocation3 + $0x2]]  ;;  %s222_s19 = smov 127  }
  0x15   :  { %v52_v11 = vand.u32 127, %v51_v10  ;;  %v55_v13 = vshrl.u32 %v51_v10, 7  ;;  %vm62_vm1 = vcmask 1041409   ;;  %vm65_vm2 = vcmask 7168   ;;  %s223_s20 = smov 126   ;;  %s69_s21 = sld [smem:[#allocation3]] }
  0x16   :  { %v38_v5 = vsel %vm36_vm0, %v32_v2, 0.0  ;;  %v43_v7 = vsel %vm36_vm0, %v33_v4, 0.0  ;;  %vm67_vm3 = vcmask 39936   ;;  %v224_v42 = vmov 839922192   ;;  %s225_s22 = smov [#allocation7]  }
  0x17   :  { %v39_v8 = vadd.f32 %v38_v5, %v37_v3  ;;  %v44_v9 = vadd.f32 %v43_v7, %v42_v6  ;;  %v53_v12 = vadd.s32 4294967295, %v52_v11  ;;  %v103_v37 = vsub.s32 1, %v55_v13  ;;  %s135_s23 = sshll.u32 %s225_s22, 4  ;;  %s136_s23 = int_to_ptr.vmem [resolvable:$true] %s135_s23 }
  0x18   :  { %v96_v38 = vsub.s32 0, %v55_v13  ;;  %v111_v43 = vunpack.c.l.s4 %v224_v42  ;;  %s192_s24 = scalar_lea.vmem %s136_s23, 256  ;;  %p197_p6 = scmp.lt.s32.totalorder %s136_s23, %s136_s23 }
  0x19   :  { %40 = vadd.xlane.f32.xlu0 %v39_v8  ;;  %v56_v15 = vsub.s32 %v53_v12, %v55_v13  ;;  %v73_v22 = vstv %s147_s1  ;;  %p193_p5 = scmp.ne.s32.totalorder %s136_s23, %s192_s24  ;;  %p198_p7 = scmp.lt.s32.totalorder %s192_s24, %s192_s24 }
  0x1a   :  { %v81_v26 = vstv %s148_s18  ;;  %v112_v44 = vunpack.c.0.s8 %v111_v43 }
  0x1b   :  { %v70_v28 = vstv %s69_s21  ;;  %p199_p8 = por %p198_p7, %p197_p6 }
  0x1c   :  { %v115_v45 = vsub.s32 %v112_v44, %v55_v13 }
  0x1d   :  { %45 = vadd.xlane.f32.xlu0 %v44_v9  ;;  %p200_p9 = pnand %p199_p8, %p193_p5 }
  0xa2   :  { %v41_v14 = vpop.xlane.xlu0 %40 }
  0xa3   :  { %v47_v16 = vmul.f32 0.00390625, %v41_v14 }
  0xa5   :  { %v57_v19 = vrot.slane %v47_v16, %v56_v15 }
  0xa6   :  { %v46_v17 = vpop.xlane.xlu0 %45 }
  0xa7   :  { %v48_v18 = vmul.f32 0.00390625, %v46_v17 }
  0xa9   :  { %v61_v20 = vrot.slane %v48_v18, %v56_v15 }
  0xab   :  { %v63_v21 = vsel %vm62_vm1, %v61_v20, %v57_v19 }
  0xac   :  { %v66_v23 = vsel %vm65_vm2, 0.0, %v63_v21 }
  0xad   :  { %v68_v24 = vsel %vm67_vm3, %v66_v23, 0.0 }
  0xae   :  { %v74_v25 = vmul.f32 %v73_v22, %v68_v24  ;;  %v82_v27 = vmul.f32 %v81_v26, %v68_v24  ;;  %v71_v30 = vmul.f32 %v70_v28, %v68_v24 }
  0xb0   :  { %76 = vrot.lane.b32.xlu1 %v74_v25, %s222_s19 }
  0xb4   :  { %84 = vrot.lane.b32.xlu1 %v82_v27, %s223_s20 }
 0x122   :  { %v77_v29 = vpop.permute.xlu1 %76 }
 0x123   :  { %v79_v31 = vadd.f32 %v77_v29, %v71_v30 }
 0x126   :  { %v85_v32 = vpop.permute.xlu1 %84 }
 0x127   :  { %v87_v33 = vadd.f32 %v85_v32, %v79_v31 }
 0x129   :  { %v149_v34 = vmul.f32 -1.442695, %v87_v33 }
 0x12b   :  { %160 = vpow2.f32 %v149_v34 }
 0x138   :  { %v161_v35 = vpop.eup %160 }
 0x139   :  { %v91_v36 = vadd.f32 1.0, %v161_v35 }
 0x13b   :  { %162 = vrcp.f32 %v91_v36 }
 0x148   :  { %v163_v39 = vpop.eup %162 }
 0x149   :  { %v104_v40 = vrot.slane %v163_v39, %v103_v37  ;;  %v97_v41 = vrot.slane %v163_v39, %v96_v38 }
 0x14b   :  { %106 = vbcast.lane.b32.xlu1 %v104_v40, 256  ;;  %99 = vbcast.lane.b32.xlu0 %v97_v41, 256 }
 0x1bd   :  { %v107_v46 = vpop.permute.xlu1 %106  ;;  %v100_v47 = vpop.permute.xlu0 %99 }
 0x1be   :  { %v123_v48 = vrot.slane %v107_v46, %v115_v45  ;;  %v116_v49 = vrot.slane %v100_v47, %v115_v45 }
 0x1c0   :  { %v127_v50 = vmul.f32 %v123_v48, %v252_v1  ;;  %v126_v51 = vmul.f32 %v116_v49, %v250_v0 }
 0x1c2   :  { %129 = vst [vmem:[#allocation7 + $0x8] sm:$0xff] %v127_v50  ;;  %128 = vst [vmem:[#allocation7] sm:$0xff] %v126_v51 }
 0x1c3   :  { %203 = shalt.err (!%p200_p9)
}
 0x1c4   :  { %141 = dma.vmem_to_hbm [thread:$0]  %s136_s23, 256, %s270_s2, [#allocation6], %s220_s15, %s220_s15, %s221_s16  }
 0x1c5   :  { %216 = dma.done.wait [#allocation6], 256  }
 0x1c6   :  { %217 = vsyncadd [#allocation6], 4294967040 }
 0x1c7   :  { %145 = vsyncpa [#allocation5], 1 }
 0x1c8   :  { %146 = vsyncpa [#allocation6], 1 }

</bundles_post_ra>
